<compile_context>
chip_gen: v6e
topology: v6e:2x2x1
jax: 0.10.0
libtpu: 0.0.40
codegen_flags: <defaults>
</compile_context>

<pallas_src>
import math
import functools

import jax
import jax.numpy as jnp
from jax.experimental import pallas as pl
from jax.experimental.pallas import tpu as pltpu


def _build_pe_table(max_seq_len: int, d_model: int) -> jnp.ndarray:
    """Deterministic sinusoidal positional-encoding table, shape (max_seq_len, d_model)."""
    assert d_model % 2 == 0, "d_model must be even (same latent assumption as the PyTorch module)"
    pos = jnp.arange(0, max_seq_len, dtype=jnp.float32)[:, None]            # (L, 1)
    div_term = jnp.exp(
        jnp.arange(0, d_model, 2, dtype=jnp.float32) * (-math.log(10000.0) / d_model)
    )[None, :]                                                               # (1, D/2)
    angles = pos * div_term                                                  # (L, D/2)
    pe = jnp.zeros((max_seq_len, d_model), dtype=jnp.float32)
    pe = pe.at[:, 0::2].set(jnp.sin(angles))
    pe = pe.at[:, 1::2].set(jnp.cos(angles))
    return pe


def _pos_enc_kernel(x_ref, pe_ref, o_ref, *, scale: float):
    # x_ref / pe_ref / o_ref: (TS, Dlane) — leading batch dim squeezed away,
    # so this is a plain rank-2 fused multiply-add (no broadcast_in_dim).
    o_ref[...] = x_ref[...] * scale + pe_ref[...]


def _choose_seq_tile(s: int, row_bytes: int, target_bytes: int) -> int:
    """Largest multiple-of-8 divisor of `s` whose (tile_rows * row_bytes) fits target."""
    if s * row_bytes <= target_bytes or s % 8 != 0:
        return s            # full extent (always legal as a block dim)
    best = 8
    for ts in range(8, s, 8):
        if s % ts == 0 and ts * row_bytes <= target_bytes:
            best = ts
    return best


def positional_encoder(x: jnp.ndarray, pe_full: jnp.ndarray,
                       *, block_target_bytes: int = 2 * 1024 * 1024) -> jnp.ndarray:
    """x: (B, S, D).  pe_full: (max_seq_len, D).  Returns x*sqrt(D) + pe[:S]."""
    B, S, D = x.shape
    assert pe_full.shape[0] >= S and pe_full.shape[1] == D
    scale = math.sqrt(D)                        # sqrt(d_model) — from the ORIGINAL d_model
    pe = pe_full[:S, :].astype(x.dtype)         # pe[:, :seq_len]; keep x's dtype (bf16-friendly)

    # Lane-density fold: if D is not a multiple of 128, concatenate k consecutive
    # sequence positions along the last dim (contiguous reshape; elementwise-safe,
    # PE reshaped identically) so stores are unmasked full-lane vst's.
    k = math.lcm(D, 128) // D
    if k > 1 and S % k == 0:
        Sf, Df = S // k, D * k
    else:
        Sf, Df = S, D                           # fall back (masked stores only if Df < 128)
    xf = x.reshape(B, Sf, Df)
    pef = pe.reshape(Sf, Df)

    itemsize = jnp.dtype(x.dtype).itemsize
    ts = _choose_seq_tile(Sf, Df * itemsize, block_target_bytes)
    grid = (Sf // ts, B)                        # batch innermost => PE block index constant

    kernel = functools.partial(_pos_enc_kernel, scale=scale)

    out = pl.pallas_call(
        kernel,
        out_shape=jax.ShapeDtypeStruct((B, Sf, Df), x.dtype),
        grid_spec=pltpu.PrefetchScalarGridSpec(
            num_scalar_prefetch=0,
            grid=grid,
            in_specs=[
                # x: one (TS, Df) slab of one batch element per step
                pl.BlockSpec((pl.Squeezed(), ts, Df), lambda s, b: (b, s, 0)),
                # PE: same (TS, Df) slab shared by every batch element; block
                # index is constant across the inner b loop so its DMA is skipped
                pl.BlockSpec((ts, Df), lambda s, b: (s, 0)),
            ],
            out_specs=pl.BlockSpec((pl.Squeezed(), ts, Df), lambda s, b: (b, s, 0)),
        ),
        compiler_params=pltpu.CompilerParams(
            dimension_semantics=("parallel", "parallel"),
        ),
    )(xf, pef)

    return out.reshape(B, S, D)


if __name__ == "__main__":
    key = jax.random.PRNGKey(0)

    # Case 1: small shapes consistent with the module (batch=2, seq=8, d_model=32).
    # d_model=32 < 128 exercises the lane-density fold: (2, 8, 32) -> (2, 2, 128).
    B, S, D, MAX_SEQ_LEN = 2, 8, 32, 200
    x = jax.random.normal(key, (B, S, D), dtype=jnp.float32)
    pe_full = _build_pe_table(MAX_SEQ_LEN, D)
    out = jax.block_until_ready(positional_encoder(x, pe_full))
    ref = x * math.sqrt(D) + pe_full[:S, :][None, :, :]
    assert out.shape == (B, S, D)
    assert jnp.allclose(out, ref, atol=1e-5, rtol=1e-5), "case 1 mismatch vs reference"

    # Case 2: lane-dense d_model and a deliberately small tile budget to force the
    # multi-tile (seq, batch) grid path (TS=16 -> grid=(4, 4)) with PE reuse.
    B2, S2, D2, MAX2 = 4, 64, 128, 128
    x2 = jax.random.normal(jax.random.PRNGKey(1), (B2, S2, D2), dtype=jnp.float32)
    pe_full2 = _build_pe_table(MAX2, D2)
    out2 = jax.block_until_ready(
        positional_encoder(x2, pe_full2, block_target_bytes=16 * 128 * 4)
    )
    ref2 = x2 * math.sqrt(D2) + pe_full2[:S2, :][None, :, :]
    assert jnp.allclose(out2, ref2, atol=1e-5, rtol=1e-5), "case 2 mismatch vs reference"

    print("KERNEL_OK")
</pallas_src>

<mosaic_0001>
module attributes {stable_mosaic.version = 11 : i64} {
  func.func @_pos_enc_kernel(%arg0: i32, %arg1: i32, %arg2: memref<1x2x128xf32, #tpu.memory_space<vmem>>, %arg3: memref<2x128xf32, #tpu.memory_space<vmem>>, %arg4: memref<1x2x128xf32, #tpu.memory_space<vmem>>) attributes {dimension_semantics = [#tpu.dimension_semantics<parallel>, #tpu.dimension_semantics<parallel>], iteration_bounds = array<i64: 1, 2>, scalar_prefetch = 0 : i64, scratch_operands = 0 : i64, tpu.core_type = #tpu.core_type<tc>, window_params = [{transform_indices = @transform_0, window_bounds = array<i64: 1, 2, 128>}, {transform_indices = @transform_1, window_bounds = array<i64: 2, 128>}, {transform_indices = @transform_2, window_bounds = array<i64: 1, 2, 128>}]} {
    %c0 = arith.constant 0 : index
    %c0_0 = arith.constant 0 : index
    %c0_1 = arith.constant 0 : index
    %0 = vector.load %arg2[%c0, %c0_0, %c0_1] : memref<1x2x128xf32, #tpu.memory_space<vmem>>, vector<1x2x128xf32>
    %1 = vector.shape_cast %0 : vector<1x2x128xf32> to vector<2x128xf32>
    %cst = arith.constant 5.65685415 : f32
    %2 = vector.broadcast %cst : f32 to vector<2x128xf32>
    %3 = arith.mulf %1, %2 : vector<2x128xf32>
    %c0_2 = arith.constant 0 : index
    %c0_3 = arith.constant 0 : index
    %4 = vector.load %arg3[%c0_2, %c0_3] : memref<2x128xf32, #tpu.memory_space<vmem>>, vector<2x128xf32>
    %5 = arith.addf %3, %4 : vector<2x128xf32>
    %c0_4 = arith.constant 0 : index
    %c0_5 = arith.constant 0 : index
    %c0_6 = arith.constant 0 : index
    %6 = vector.load %arg4[%c0_4, %c0_5, %c0_6] : memref<1x2x128xf32, #tpu.memory_space<vmem>>, vector<1x2x128xf32>
    %7 = vector.shape_cast %6 : vector<1x2x128xf32> to vector<2x128xf32>
    %8 = vector.shape_cast %5 : vector<2x128xf32> to vector<1x2x128xf32>
    tpu.vector_store %arg4[%c0_4, %c0_5, %c0_6], %8 {strides = array<i32>} : memref<1x2x128xf32, #tpu.memory_space<vmem>>, vector<1x2x128xf32>,
    return
  }
  func.func @transform_0(%arg0: i32, %arg1: i32) -> (i32, i32, i32) {
    %c0_i32 = arith.constant 0 : i32
    %c0_i32_0 = arith.constant 0 : i32
    return %arg1, %arg0, %c0_i32 : i32, i32, i32
  }
  func.func @transform_1(%arg0: i32, %arg1: i32) -> (i32, i32) {
    %c0_i32 = arith.constant 0 : i32
    %c0_i32_0 = arith.constant 0 : i32
    return %arg0, %c0_i32 : i32, i32
  }
  func.func @transform_2(%arg0: i32, %arg1: i32) -> (i32, i32, i32) {
    %c0_i32 = arith.constant 0 : i32
    %c0_i32_0 = arith.constant 0 : i32
    return %arg1, %arg0, %c0_i32 : i32, i32, i32
  }
}

</mosaic_0001>

<bundles_post_ra>
// kernel: tpu_custom_call.1
= control target key start
LH: loop header
LB: loop body
LE: loop exit
PB: predicated region body
PF: predicated region fallthrough
CT: control target
= control target key end

     0   :  { %7 = vsyncpa [#allocation3], 0  ;;  %s715_s0 = inlined_call_operand.hbm [shape: f32[2,2,128], index: 0, kind: input, shape index: {}]   ;;  %s716_s1 = inlined_call_operand.hbm [shape: f32[2,128], index: 1, kind: input, shape index: {}]   ;;  %s717_s2 = inlined_call_operand.hbm [shape: f32[2,2,128], index: 2, kind: output, shape index: {}]  }
   0x1   :  { %9 = vsyncpa [#allocation3 + $0x1], 0 }
   0x2   :  { %10 = vsyncpa [#allocation6], 0 }
   0x3   :  { %11 = vsyncpa [#allocation4], 0 }
   0x4   :  { %13 = vsyncpa [#allocation4 + $0x1], 0  ;;  %s554_s9 = smov 0   ;;  %s556_s10 = smov 0  }
   0x5   :  { %s558_s11 = smov 0   ;;  %s560_s12 = smov 0  }
   0x6   :  { %s562_s13 = smov 0   ;;  %s564_s14 = smov 0  }
   0x7 LB: > { %s308_s15 = sadd.s32 4294967295, %s534_s14   ;;  %s309_s16 = sadd.s32 4294967294, %s534_s14   ;;  %s534_s14 = sphi %s564_s14, %s19_s14   ;;  %s530_s13 = sphi %s562_s13, %s734_s13   ;;  %s526_s12 = sphi %s560_s12, %s733_s12   ;;  %s522_s11 = sphi %s558_s11, %s732_s11   ;;  %s518_s10 = sphi %s556_s10, %s731_s10   ;;  %s514_s9 = sphi %s554_s9, %s730_s9  }
   0x8   : > { %p53_p0 = scmp.ne.s32.totalorder %s518_s10, %s514_s9  ;;  %p588_p1 = scmp.eq.s32.totalorder %s308_s15, 0 }
   0x9   : > { %p592_p2 = scmp.eq.s32.totalorder %s308_s15, 1  ;;  %p111_p3 = scmp.eq.s32.totalorder %s309_s16, 1 }
   0xa   : > { %p598_p4 = por %p588_p1, %p53_p0  ;;  %p310_p5 = scmp.ge.s32.totalorder %s534_s14, 1 }
   0xb   : > { %p603_p6 = por %p111_p3, %p53_p0  ;;  %p118_p7 = scmp.lt.s32.totalorder %s534_s14, 3 }
   0xc   : > { %s721_s19 = scalar_select %p598_p4, 1, 0 }
   0xd   : > { %s722_s20 = scalar_select %p603_p6, 1, 0 }
   0xe   : > { %p608_p8 = pnand %p310_p5, %p118_p7  ;;  %s536_s22 = smov [#allocation5]  }
   0xf   : > { %s133_s23 = sshll.u32 %s536_s22, 4  ;;  %s28_s25 = sadd.s32 1, %s530_s13  ;;  %s134_s23 = int_to_ptr.vmem [resolvable:$true] %s133_s23 }
  0x10   : > { %p331_p10 = pneg %p608_p8  ;;  %s40_s26 = sadd.s32 1, %s522_s11 }
  0x11   : > { %p29_p12 = scmp.ge.s32.totalorder %s28_s25, 2  ;;  %s407_s27 = scalar_lea.vmem %s134_s23, 32 }
  0x12   : > { %p617_p11 = pnand %p331_p10, %p588_p1  ;;  %p408_p0 = scmp.ne.s32.totalorder %s134_s23, %s407_s27 }
  0x13   : > { %p415_p7 = scmp.lt.s32.totalorder %s134_s23, %s134_s23  ;;  %p416_p6 = scmp.lt.s32.totalorder %s407_s27, %s407_s27 }
  0x14   : > { %p398_p13 = pneg %p617_p11 }
  0x15   : > { %p417_p9 = por %p416_p6, %p415_p7 }
  0x16   : > { %p410_p3 = pnand %p408_p0, %p398_p13 }
  0x18   : > { %p411_p5 = pneg %p410_p3 }
  0x1a   : > { %p418_p4 = pnand %p417_p9, %p411_p5 }
  0x1c   : > { %421 = shalt.err (!%p418_p4)
}
  0x1d   : > { %334 = dma.hbm_to_vmem [thread:$0]  (!%p617_p11), %s716_s1, 32, %s134_s23, [#allocation6]  }
  0x1e   : > { %s736_s25 = smov (%p29_p12, %s28_s25), 0  ;;  %p47_p6 = scmp.ne.s32.totalorder %s522_s11, %s518_s10 }
  0x1f   : > { %p48_p4 = scmp.eq.s32.totalorder %s534_s14, 0  ;;  %s35_s30 = ssub.s32 %s530_s13, %s736_s25 }
  0x20   : > { %p344_p9 = scmp.lt.s32.totalorder %s534_s14, 2  ;;  %p38_p10 = scmp.eq.s32.totalorder %s35_s30, 0 }
  0x21   : > { %p49_p13 = por %p48_p4, %p47_p6  ;;  %p640_p0 = por %p592_p2, %p47_p6 }
  0x22   : > { %s144_s4 = sand.u32 1, %s522_s11   ;;  %s314_s7 = sshll.u32 %s530_s13, 5 }
  0x23   : > { %s646_s5 = scalar_select %p38_p10, %s522_s11, %s40_s26  }
  0x24   : > { %s313_s6 = sshll.u32 %s144_s4, 1  ;;  %s154_s16 = scalar_lea.hbm %s715_s0, %s314_s7 }
  0x25   : > { %s148_s22 = scalar_lea.vmem [#allocation2], %s313_s6  ;;  %p652_p11 = pnand %p344_p9, %p49_p13 }
  0x26   : > { %s156_s23 = sshll.u32 %s148_s22, 4  ;;  %s145_s18 = scalar_lea.sflag [#allocation3], %s144_s4  ;;  %s157_s23 = int_to_ptr.vmem [resolvable:$true] %s156_s23 }
  0x27   : > { %p424_p2 = pneg %p652_p11  ;;  %s435_s27 = scalar_lea.vmem %s157_s23, 32 }
  0x28   : > { %p436_p12 = scmp.ne.s32.totalorder %s157_s23, %s435_s27  ;;  %s537_s26 = smov [#allocation2]  }
  0x29   : > { %s440_s28 = sshll.u32 %s537_s26, 4  ;;  %s441_s28 = int_to_ptr.vmem [resolvable:$false] %s440_s28 }
  0x2a   : > { %p438_p3 = pnand %p436_p12, %p424_p2  ;;  %s442_s29 = scalar_lea.vmem %s441_s28, 64 }
  0x2b   : > { %p443_p7 = scmp.lt.s32.totalorder %s157_s23, %s441_s28  ;;  %p444_p6 = scmp.lt.s32.totalorder %s442_s29, %s435_s27 }
  0x2c   : > { %p439_p5 = pneg %p438_p3 }
  0x2d   : > { %p445_p4 = por %p444_p6, %p443_p7 }
  0x2f   : > { %p446_p10 = pnand %p445_p4, %p439_p5 }
  0x31   : > { %449 = shalt.err (!%p446_p10)
}
  0x32   : > { %338 = dma.hbm_to_vmem [thread:$0]  (!%p652_p11), %s154_s16, 32, %s157_s23, %s145_s18  }
  0x33   : > { %165 = sbr.rel (%p608_p8) target bundleno = 84 (0x54), region = 28  ;;  %s663_s30 = sand.u32 (!%p608_p8), 1, %s518_s10  }
  0x34   : > { %s316_s4 = sshll.u32 (!%p608_p8), %s663_s30, 1  ;;  %s168_s6 = scalar_lea.sflag (!%p608_p8), [#allocation3], %s663_s30 }
  0x35   : > { %s171_s7 = scalar_lea.vmem (!%p608_p8), [#allocation2], %s316_s4  ;;  %p727_p9 = scmp.ne.s32.totalorder (!%p608_p8), %s721_s19, 0 }
  0x38   : > { %501 = dma.done.wait (%p727_p9), %s168_s6, 32  }
  0x39   : > { %503 = vsyncadd (%p727_p9), %s168_s6, 4294967264 }
  0x3a   : > { %505 = dma.done.wait (%p588_p1), [#allocation6], 32  }
  0x3b   : > { %507 = vsyncadd (%p588_p1), [#allocation6], 4294967264  ;;  %v196_v0 = vld [vmem:[%s171_s7] sm:$0x3]  ;;  %v198_v1 = vld [vmem:[#allocation5] sm:$0x3] }
  0x3c   : > { %s195_s21 = scalar_lea.vmem [#allocation7], %s316_s4  ;;  %s320_s15 = sshll.u32 %s526_s12, 5  ;;  %v197_v2 = vmul.f32 5.656854, %v196_v0 }
  0x3d   : > { %s216_s8 = sshll.u32 %s195_s21, 4  ;;  %s214_s22 = scalar_lea.hbm %s717_s2, %s320_s15  ;;  %s217_s8 = int_to_ptr.vmem [resolvable:$true] %s216_s8 }
  0x3e   : > { %v199_v3 = vadd.f32 %v198_v1, %v197_v2  ;;  %s202_s23 = scalar_lea.sflag [#allocation4], %s663_s30  ;;  %s450_s24 = scalar_lea.vmem %s217_s8, 32 }
  0x3f   : > { %p451_p8 = scmp.ne.s32.totalorder %s217_s8, %s450_s24  ;;  %s538_s17 = smov [#allocation7]  }
  0x40   : > { %200 = vst [vmem:[%s195_s21] sm:$0x3] %v199_v3  ;;  %s454_s18 = sshll.u32 %s538_s17, 4  ;;  %s455_s18 = int_to_ptr.vmem [resolvable:$false] %s454_s18 }
  0x41   : > { %p452_p1 = pnand %p451_p8, %p640_p0  ;;  %s456_s27 = scalar_lea.vmem %s455_s18, 64 }
  0x42   : > { %p457_p11 = scmp.lt.s32.totalorder %s217_s8, %s455_s18  ;;  %p458_p2 = scmp.lt.s32.totalorder %s456_s27, %s450_s24 }
  0x43   : > { %p453_p13 = pneg %p452_p1 }
  0x44   : > { %p459_p12 = por %p458_p2, %p457_p11 }
  0x46   : > { %p460_p3 = pnand %p459_p12, %p453_p13 }
  0x48   : > { %463 = shalt.err (!%p460_p3)
}
  0x49   : > { %s464_s12 = scalar_lea.hbm %s214_s22, 32  ;;  %s468_s29 = scalar_lea.hbm %s717_s2, 64 }
  0x4a   : > { %p465_p5 = scmp.ne.s32.totalorder %s214_s22, %s464_s12  ;;  %p469_p4 = scmp.lt.s32.totalorder %s214_s22, %s717_s2 }
  0x4b   : > { %p470_p10 = scmp.lt.s32.totalorder %s468_s29, %s464_s12 }
  0x4c   : > { %p466_p7 = pnand %p465_p5, %p640_p0 }
  0x4d   : > { %p471_p9 = por %p470_p10, %p469_p4 }
  0x4e   : > { %p467_p6 = pneg %p466_p7 }
  0x50   : > { %p472_p8 = pnand %p471_p9, %p467_p6 }
  0x52   : > { %475 = shalt.err (!%p472_p8)
}
  0x53   : > { %329 = dma.vmem_to_hbm [thread:$0]  (%p640_p0), %s217_s8, 32, %s214_s22, %s202_s23  }
  0x54 PF: > { %s228_s6 = sand.u32 1, %s514_s9   ;;  %p728_p1 = scmp.ne.s32.totalorder %s722_s20, 0 }
  0x55   : > { %p729_p13 = scmp.ge.s32.totalorder %s534_s14, 2  ;;  %s229_s7 = scalar_lea.sflag [#allocation4], %s228_s6 }
  0x57   : > { %p340_p11 = pnand %p729_p13, %p728_p1 }
  0x59   : > { %p341_p2 = pneg %p340_p11 }
  0x5b   : > { %509 = dma.done.wait (%p341_p2), %s229_s7, 32  }
  0x5c   : > { %511 = vsyncadd (%p341_p2), %s229_s7, 4294967264  ;;  %s19_s14 = sadd.s32 1, %s534_s14   ;;  %s730_s9 = smov %s518_s10 }
  0x5d   : > { %p16_p12 = scmp.ge.s32.totalorder %s19_s14, 4   ;;  %s731_s10 = smov %s522_s11 }
  0x5e   : > { %s732_s11 = smov %s646_s5  ;;  %s733_s12 = smov %s530_s13 }
  0x5f   : > { %s734_s13 = smov %s736_s25  ;;  %18 = sbr.rel (!%p16_p12) target bundleno = 7 (0x7), region = 78 }
  0x64   :  { %234 = vsyncpa [#allocation3], 1 }
  0x65   :  { %236 = vsyncpa [#allocation3 + $0x1], 1 }
  0x66   :  { %237 = vsyncpa [#allocation6], 1 }
  0x67   :  { %238 = vsyncpa [#allocation4], 1 }
  0x68   :  { %240 = vsyncpa [#allocation4 + $0x1], 1 }

</bundles_post_ra>
